<compile_context>
chip_gen: v7x
topology: tpu7x:2x2x1
jax: 0.10.0
libtpu: 0.0.40
codegen_flags: <defaults>
</compile_context>

<pallas_src>
import functools

import jax
import jax.numpy as jnp
from jax.experimental import pallas as pl
from jax.experimental.pallas import tpu as pltpu

_LANE = 128
_MAX_BLOCK_BYTES = 4 * 1024 * 1024      # per-operand, per-pipeline-buffer budget
_VMEM_LIMIT_BYTES = 32 * 1024 * 1024    # safe scoped-VMEM request on v5e/v6e/v7x


# --------------------------------------------------------------------------- #
# Pooling kernel: (B, C, S) -> (B, C) spatial mean, pipelined over S (and B).  #
# --------------------------------------------------------------------------- #
def _pool_kernel(x_ref, o_ref, acc_ref, *, s_total, s_tile, inv_s, needs_mask):
    si = pl.program_id(1)

    @pl.when(si == 0)
    def _init():
        acc_ref[...] = jnp.zeros_like(acc_ref)

    x = x_ref[...]                                      # (B_t, C, S_t), input dtype
    if needs_mask:
        # last spatial tile may overhang the array: zero the out-of-range lanes
        lane = jax.lax.broadcasted_iota(jnp.int32, x.shape, dimension=x.ndim - 1)
        valid = (si * s_tile + lane) < s_total
        x = jnp.where(valid, x, jnp.zeros((), dtype=x.dtype))

    # accumulate in f32 (cast happens inside the reduce, not on the full tile)
    acc_ref[...] += jnp.sum(x, axis=-1, dtype=jnp.float32)

    @pl.when(si == pl.num_programs(1) - 1)
    def _finalize():
        o_ref[...] = acc_ref[...] * jnp.float32(inv_s)


def _adaptive_avg_pool(x3):
    """adaptive_avg_pool2d((1,1)) + view(B,-1) for a (B, C, S) array -> (B, C) f32."""
    B, C, S = x3.shape
    dsize = jnp.dtype(x3.dtype).itemsize

    # Spatial tile: full S if it fits the block budget, else a 128-multiple chunk.
    if C * S * dsize <= _MAX_BLOCK_BYTES:
        s_tile = S
    else:
        s_tile = max(_LANE,
                     min(2048, (_MAX_BLOCK_BYTES // (C * dsize)) // _LANE * _LANE))

    # Batch tile: stay inside the budget; the 2D output block's second-to-last
    # dim must be a multiple of 8 or the full batch.
    b_budget = max(1, _MAX_BLOCK_BYTES // max(1, C * s_tile * dsize))
    b_tile = B if b_budget >= B else max(8, (b_budget // 8) * 8)

    grid = (pl.cdiv(B, b_tile), pl.cdiv(S, s_tile))
    needs_mask = (S % s_tile) != 0

    kernel = functools.partial(
        _pool_kernel, s_total=S, s_tile=s_tile, inv_s=1.0 / S, needs_mask=needs_mask)

    return pl.pallas_call(
        kernel,
        out_shape=jax.ShapeDtypeStruct((B, C), jnp.float32),
        grid_spec=pltpu.PrefetchScalarGridSpec(
            num_scalar_prefetch=0,
            grid=grid,
            in_specs=[pl.BlockSpec((b_tile, C, s_tile), lambda b, s: (b, 0, s))],
            out_specs=pl.BlockSpec((b_tile, C), lambda b, s: (b, 0)),
            scratch_shapes=[pltpu.VMEM((b_tile, C), jnp.float32)],
        ),
        compiler_params=pltpu.CompilerParams(
            dimension_semantics=("parallel", "arbitrary"),
            vmem_limit_bytes=_VMEM_LIMIT_BYTES,
        ),
    )(x3)


# --------------------------------------------------------------------------- #
# Cosine finalize kernel: (B, Cc), (B, Cs) pooled features -> mean cosine sim. #
# --------------------------------------------------------------------------- #
def _cosine_kernel(c_ref, s_ref, o_ref, *, target_c, inv_b):
    # Channel truncation as a static in-kernel slice (no wrapper-side HBM copy).
    c = c_ref[...][:, :target_c].astype(jnp.float32)    # (B, Ct)
    s = s_ref[...][:, :target_c].astype(jnp.float32)    # (B, Ct)

    dot = jnp.sum(c * s, axis=1, keepdims=True)          # (B, 1)
    cn2 = jnp.sum(c * c, axis=1, keepdims=True)
    sn2 = jnp.sum(s * s, axis=1, keepdims=True)

    # F.normalize(dim=1): x / max(||x||, 1e-12). Clamping the squared norms at
    # eps^2 gives exactly  dot / (max(||c||,eps) * max(||s||,eps)).
    eps2 = jnp.float32(1e-24)
    denom = jnp.maximum(cn2, eps2) * jnp.maximum(sn2, eps2)
    cos = dot * jax.lax.rsqrt(denom)                      # (B, 1)

    o_ref[0, 0] = jnp.sum(cos) * jnp.float32(inv_b)       # batch-mean cosine sim


# --------------------------------------------------------------------------- #
# Public wrapper.                                                              #
# --------------------------------------------------------------------------- #
def enhanced_feature_alignment_loss(client_features, server_features, round_idx=0):
    def prep(x):
        if x.ndim == 4:
            b, c, h, w = x.shape
            return _adaptive_avg_pool(x.reshape(b, c, h * w))   # (B, C) f32
        if x.ndim == 2:
            return x    # 2D path: channels already on the lane axis, no pooling
        raise ValueError(f"unsupported feature rank {x.ndim}")

    c2 = prep(client_features)
    s2 = prep(server_features)

    B = c2.shape[0]
    target_c = min(c2.shape[1], s2.shape[1])

    cos_sim = pl.pallas_call(
        functools.partial(_cosine_kernel, target_c=target_c, inv_b=1.0 / B),
        out_shape=jax.ShapeDtypeStruct((1, 1), jnp.float32),
        in_specs=[
            pl.BlockSpec(memory_space=pltpu.VMEM),
            pl.BlockSpec(memory_space=pltpu.VMEM),
        ],
        out_specs=pl.BlockSpec(memory_space=pltpu.SMEM),
        compiler_params=pltpu.CompilerParams(vmem_limit_bytes=_VMEM_LIMIT_BYTES),
    )(c2, s2)[0, 0]

    alignment_weight = min(0.8, 0.2 + round_idx / 100)
    return (jnp.float32(1.0) - cos_sim) * jnp.float32(alignment_weight)


# --------------------------------------------------------------------------- #
# Pure-JAX reference (mirrors the PyTorch forward).                            #
# --------------------------------------------------------------------------- #
def _reference_loss(client_features, server_features, round_idx=0):
    def pool(x):
        if x.ndim == 4:
            return jnp.mean(x.astype(jnp.float32), axis=(2, 3))
        return x.astype(jnp.float32)

    c = pool(client_features)
    s = pool(server_features)
    tc = min(c.shape[1], s.shape[1])
    c = c[:, :tc]
    s = s[:, :tc]
    eps = 1e-12
    c_n = c / jnp.maximum(jnp.linalg.norm(c, axis=1, keepdims=True), eps)
    s_n = s / jnp.maximum(jnp.linalg.norm(s, axis=1, keepdims=True), eps)
    cosine_sim = jnp.mean(jnp.sum(c_n * s_n, axis=1))
    weight = min(0.8, 0.2 + round_idx / 100)
    return (1.0 - cosine_sim) * weight


if __name__ == "__main__":
    key = jax.random.PRNGKey(0)
    k1, k2, k3, k4 = jax.random.split(key, 4)

    # Case 1: both 4D, channel mismatch (4 vs 8), different spatial sizes.
    client_a = jax.random.normal(k1, (2, 4, 16, 16), dtype=jnp.float32)
    server_a = jax.random.normal(k2, (2, 8, 8, 8), dtype=jnp.float32)
    loss_a = jax.block_until_ready(
        enhanced_feature_alignment_loss(client_a, server_a, round_idx=30))
    ref_a = _reference_loss(client_a, server_a, round_idx=30)
    assert jnp.allclose(loss_a, ref_a, atol=1e-5, rtol=1e-5), (loss_a, ref_a)

    # Case 2: bf16 4D client + 2D f32 server (2D fast path), weight clamp at 0.8.
    client_b = jax.random.normal(k3, (2, 16, 8, 8), dtype=jnp.bfloat16)
    server_b = jax.random.normal(k4, (2, 12), dtype=jnp.float32)
    loss_b = jax.block_until_ready(
        enhanced_feature_alignment_loss(client_b, server_b, round_idx=250))
    ref_b = _reference_loss(client_b, server_b, round_idx=250)
    assert jnp.allclose(loss_b, ref_b, atol=1e-4, rtol=1e-4), (loss_b, ref_b)

    print("KERNEL_OK")
</pallas_src>

<mosaic_0001>
module attributes {stable_mosaic.version = 11 : i64} {
  func.func @_pool_kernel(%arg0: i32, %arg1: i32, %arg2: memref<2x4x256xf32, #tpu.memory_space<vmem>>, %arg3: memref<2x4xf32, #tpu.memory_space<vmem>>, %arg4: memref<2x4xf32, #tpu.memory_space<vmem>>) attributes {dimension_semantics = [#tpu.dimension_semantics<parallel>, #tpu.dimension_semantics<arbitrary>], iteration_bounds = array<i64: 1, 1>, scalar_prefetch = 0 : i64, scratch_operands = 1 : i64, tpu.core_type = #tpu.core_type<tc>, window_params = [{transform_indices = @transform_0, window_bounds = array<i64: 2, 4, 256>}, {transform_indices = @transform_1, window_bounds = array<i64: 2, 4>}]} {
    %c0_i32 = arith.constant 0 : i32
    %0 = arith.cmpi eq, %arg1, %c0_i32 : i32
    %1 = arith.extui %0 : i1 to i32
    %c0_i32_0 = arith.constant 0 : i32
    %2 = arith.cmpi ne, %1, %c0_i32_0 : i32
    scf.if %2 {
      %cst_9 = arith.constant 0.000000e+00 : f32
      %11 = vector.broadcast %cst_9 : f32 to vector<2x4xf32>
      %c0_10 = arith.constant 0 : index
      %c0_11 = arith.constant 0 : index
      %12 = vector.load %arg4[%c0_10, %c0_11] : memref<2x4xf32, #tpu.memory_space<vmem>>, vector<2x4xf32>
      tpu.vector_store %arg4[%c0_10, %c0_11], %11 {strides = array<i32>} : memref<2x4xf32, #tpu.memory_space<vmem>>, vector<2x4xf32>,
    } else {
    }
    %c0 = arith.constant 0 : index
    %c0_1 = arith.constant 0 : index
    %c0_2 = arith.constant 0 : index
    %3 = vector.load %arg2[%c0, %c0_1, %c0_2] : memref<2x4x256xf32, #tpu.memory_space<vmem>>, vector<2x4x256xf32>
    %c0_3 = arith.constant 0 : index
    %c0_4 = arith.constant 0 : index
    %4 = vector.load %arg4[%c0_3, %c0_4] : memref<2x4xf32, #tpu.memory_space<vmem>>, vector<2x4xf32>
    %cst = arith.constant dense<0.000000e+00> : vector<2x4xf32>
    %5 = vector.multi_reduction <add>, %3, %cst [2] : vector<2x4x256xf32> to vector<2x4xf32>
    %6 = arith.addf %4, %5 : vector<2x4xf32>
    %c0_5 = arith.constant 0 : index
    %c0_6 = arith.constant 0 : index
    %7 = vector.load %arg4[%c0_5, %c0_6] : memref<2x4xf32, #tpu.memory_space<vmem>>, vector<2x4xf32>
    tpu.vector_store %arg4[%c0_5, %c0_6], %6 {strides = array<i32>} : memref<2x4xf32, #tpu.memory_space<vmem>>, vector<2x4xf32>,
    %c0_i32_7 = arith.constant 0 : i32
    %8 = arith.cmpi eq, %arg1, %c0_i32_7 : i32
    %9 = arith.extui %8 : i1 to i32
    %c0_i32_8 = arith.constant 0 : i32
    %10 = arith.cmpi ne, %9, %c0_i32_8 : i32
    scf.if %10 {
      %c0_9 = arith.constant 0 : index
      %c0_10 = arith.constant 0 : index
      %11 = vector.load %arg4[%c0_9, %c0_10] : memref<2x4xf32, #tpu.memory_space<vmem>>, vector<2x4xf32>
      %cst_11 = arith.constant 3.906250e-03 : f32
      %12 = vector.broadcast %cst_11 : f32 to vector<2x4xf32>
      %13 = arith.mulf %11, %12 : vector<2x4xf32>
      %c0_12 = arith.constant 0 : index
      %c0_13 = arith.constant 0 : index
      %14 = vector.load %arg3[%c0_12, %c0_13] : memref<2x4xf32, #tpu.memory_space<vmem>>, vector<2x4xf32>
      tpu.vector_store %arg3[%c0_12, %c0_13], %13 {strides = array<i32>} : memref<2x4xf32, #tpu.memory_space<vmem>>, vector<2x4xf32>,
    } else {
    }
    return
  }
  func.func @transform_0(%arg0: i32, %arg1: i32) -> (i32, i32, i32) {
    %c0_i32 = arith.constant 0 : i32
    %c0_i32_0 = arith.constant 0 : i32
    return %arg0, %c0_i32, %arg1 : i32, i32, i32
  }
  func.func @transform_1(%arg0: i32, %arg1: i32) -> (i32, i32) {
    %c0_i32 = arith.constant 0 : i32
    %c0_i32_0 = arith.constant 0 : i32
    return %arg0, %c0_i32 : i32, i32
  }
}

</mosaic_0001>

<bundles_post_ra>
// kernel: tpu_custom_call.1
= control target key start
LH: loop header
LB: loop body
LE: loop exit
PB: predicated region body
PF: predicated region fallthrough
CT: control target
= control target key end

     0   :  { %6 = vsyncpa [#allocation4], 0  ;;  %s185_s0 = inlined_call_operand.hbm [shape: f32[2,4,256], index: 0, kind: input, shape index: {}]   ;;  %s186_s1 = inlined_call_operand.hbm [shape: f32[2,4], index: 1, kind: output, shape index: {}]  }
   0x1   :  { %7 = vsyncpa [#allocation5], 0  ;;  %s143_s6 = smov [#allocation3]   ;;  %s95_s10 = scalar_lea.hbm %s185_s0, 256 }
   0x2   :  { %s13_s7 = sshll.u32 %s143_s6, 4  ;;  %p96_p0 = scmp.ne.s32.totalorder %s185_s0, %s95_s10  ;;  %s14_s7 = int_to_ptr.vmem [resolvable:$true] %s13_s7 }
   0x3   :  { %p99_p1 = scmp.lt.u32.totalorder %s95_s10, %s185_s0 }
   0x5   :  { %p101_p2 = pnand %p99_p1, %p96_p0 }
   0x7   :  { %104 = shalt.err (!%p101_p2)
}
   0x8   :  { %s105_s15 = scalar_lea.vmem %s14_s7, 256  ;;  %p110_p4 = scmp.lt.s32.totalorder %s14_s7, %s14_s7 }
   0x9   :  { %p106_p3 = scmp.ne.s32.totalorder %s14_s7, %s105_s15  ;;  %p111_p5 = scmp.lt.s32.totalorder %s105_s15, %s105_s15 }
   0xb   :  { %p112_p6 = por %p111_p5, %p110_p4 }
   0xd   :  { %p113_p7 = pnand %p112_p6, %p106_p3 }
   0xf   :  { %116 = shalt.err (!%p113_p7)
}
  0x10   :  { %s144_s16 = smov 128   ;;  %s145_s17 = smov 8  }
  0x11   :  { %19 = dma.hbm_to_vmem [thread:$0]  %s185_s0, 256, %s14_s7, [#allocation4], %s144_s16, %s144_s16, %s145_s17  }
  0x12   :  { %139 = dma.done.wait [#allocation4], 256  }
  0x13   :  { %140 = vsyncadd [#allocation4], 4294967040  ;;  %vm38_vm0 = vcmask 1043456   ;;  %v29_v0 = vld [vmem:[#allocation3] sm:$0xff]  ;;  %v30_v1 = vld [vmem:[#allocation3 + $0x8] sm:$0xff]  ;;  %vm27_vm1 = vcmask 25600   ;;  %v51_v11 = vlaneseq }
  0x14   :  { %v34_v2 = vcombine.high %v29_v0, %v29_v0  ;;  %v39_v3 = vsel %vm38_vm0, %v29_v0, 0.0  ;;  %v35_v4 = vcombine.high %v30_v1, %v30_v1  ;;  %v44_v6 = vsel %vm38_vm0, %v30_v1, 0.0  ;;  %s147_s0 = smov [#allocation6]  }
  0x15   :  { %v146_v10 = vmov 0.0   ;;  %v52_v12 = vand.u32 127, %v51_v11  ;;  %v54_v13 = vshrl.u32 %v51_v11, 7  ;;  %vm61_vm2 = vcmask 1041409   ;;  %s79_s20 = sshll.u32 %s147_s0, 4  ;;  %s80_s20 = int_to_ptr.vmem [resolvable:$true] %s79_s20 }
  0x16   :  { %v40_v5 = vsel %vm38_vm0, %v34_v2, 0.0  ;;  %v45_v7 = vsel %vm38_vm0, %v35_v4, 0.0  ;;  %28 = vst.msk [vmem:[#allocation2] sm:$0x3] %vm27_vm1, %v146_v10  ;;  %s117_s21 = scalar_lea.vmem %s80_s20, 32  ;;  %p122_p9 = scmp.lt.s32.totalorder %s80_s20, %s80_s20 }
  0x17   :  { %v41_v8 = vadd.f32 %v40_v5, %v39_v3  ;;  %v46_v9 = vadd.f32 %v45_v7, %v44_v6  ;;  %v55_v15 = vsub.s32 %v52_v12, %v54_v13  ;;  %p118_p8 = scmp.ne.s32.totalorder %s80_s20, %s117_s21  ;;  %p123_p10 = scmp.lt.s32.totalorder %s117_s21, %s117_s21 }
  0x19   :  { %42 = vadd.xlane.f32.xlu0 %v41_v8  ;;  %p124_p11 = por %p123_p10, %p122_p9 }
  0x1b   :  { %p125_p12 = pnand %p124_p11, %p118_p8 }
  0x1d   :  { %47 = vadd.xlane.f32.xlu0 %v46_v9  ;;  %v31_v19 = vld [vmem:[#allocation2] sm:$0x3] }
  0xa6   :  { %v43_v14 = vpop.xlane.xlu0 %42 }
  0xa7   :  { %v56_v17 = vrot.slane %v43_v14, %v55_v15 }
  0xaa   :  { %v48_v16 = vpop.xlane.xlu0 %47 }
  0xab   :  { %v60_v18 = vrot.slane %v48_v16, %v55_v15 }
  0xad   :  { %v62_v20 = vsel %vm61_vm2, %v60_v18, %v56_v17 }
  0xae   :  { %v64_v21 = vadd.f32 %v62_v20, %v31_v19 }
  0xb0   :  { %66 = vst.msk [vmem:[#allocation2] sm:$0x3] %vm27_vm1, %v64_v21 }
  0xb7   :  { %v70_v22 = vld [vmem:[#allocation2] sm:$0x3] }
  0xb8   :  { %v71_v23 = vmul.f32 0.00390625, %v70_v22 }
  0xba   :  { %72 = vst.msk [vmem:[#allocation6] sm:$0x3] %vm27_vm1, %v71_v23 }
  0xbb   :  { %128 = shalt.err (!%p125_p12)
}
  0xbc   :  { %s129_s24 = scalar_lea.hbm %s186_s1, 32 }
  0xbd   :  { %p130_p13 = scmp.ne.s32.totalorder %s186_s1, %s129_s24  ;;  %p133_p0 = scmp.lt.u32.totalorder %s129_s24, %s186_s1 }
  0xbf   :  { %p135_p1 = pnand %p133_p0, %p130_p13 }
  0xc1   :  { %138 = shalt.err (!%p135_p1)
}
  0xc2   :  { %82 = dma.vmem_to_hbm [thread:$0]  %s80_s20, 32, %s186_s1, [#allocation5]  }
  0xc3   :  { %141 = dma.done.wait [#allocation5], 32  }
  0xc4   :  { %142 = vsyncadd [#allocation5], 4294967264 }
  0xc5   :  { %86 = vsyncpa [#allocation4], 1 }
  0xc6   :  { %87 = vsyncpa [#allocation5], 1 }

</bundles_post_ra>
